<compile_context>
chip_gen: v7x
topology: tpu7x:2x2x1
jax: 0.10.0
libtpu: 0.0.40
codegen_flags: <defaults>
</compile_context>

<pallas_src>
import functools

import jax
import jax.numpy as jnp
from jax import lax
from jax.experimental import pallas as pl
from jax.experimental.pallas import tpu as pltpu


_VMEM_SPEC = pl.BlockSpec(memory_space=pltpu.MemorySpace.VMEM)


# ---------------------------------------------------------------------------
# Kernel building blocks
# ---------------------------------------------------------------------------

def _input_projection(x_ref, wih_t_ref, b_ref, xg_ref):
    """One big MXU matmul for all time steps; bias folded in once.

    x_ref    : (T, B, F)
    wih_t_ref: (F, 4H)     pre-transposed W_ih
    b_ref    : (1, 4H)     bias_ih + bias_hh
    xg_ref   : (T, B, 4H)  VMEM scratch (written)
    """
    T, B, F = x_ref.shape
    G = wih_t_ref.shape[-1]
    x_flat = x_ref[...].reshape(T * B, F)
    xg = (jnp.dot(x_flat, wih_t_ref[...], preferred_element_type=jnp.float32)
          + b_ref[...])
    xg_ref[...] = xg.reshape(T, B, G)


def _recurrence(whh_t_ref, h0_ref, c0_ref, xg_ref, store_h):
    """Serial LSTM recurrence; only h @ W_hh^T + precomputed gates inside the loop."""
    T = xg_ref.shape[0]
    H = h0_ref.shape[-1]
    w_hh_t = whh_t_ref[...]                      # (H, 4H) -- pre-transposed in wrapper

    def step(t, carry):
        h, c = carry
        gates = xg_ref[t] + jnp.dot(h, w_hh_t, preferred_element_type=jnp.float32)
        # Full-slab activations (one 4H-wide EUP pass each) instead of four
        # sub-vreg activations; then cheap lane slices (PyTorch order i, f, g, o).
        sig = jax.nn.sigmoid(gates)              # (B, 4H)
        tg = jnp.tanh(gates)                     # (B, 4H)
        i = sig[:, 0 * H:1 * H]
        f = sig[:, 1 * H:2 * H]
        g = tg[:, 2 * H:3 * H]
        o = sig[:, 3 * H:4 * H]
        c_new = f * c + i * g
        h_new = o * jnp.tanh(c_new)
        store_h(t, h_new)
        return (h_new, c_new)

    unroll = True if T <= 32 else 8
    return lax.fori_loop(0, T, step, (h0_ref[...], c0_ref[...]), unroll=unroll)


def _lstm_layer_kernel(x_ref, wih_t_ref, whh_t_ref, b_ref, h0_ref, c0_ref,
                       out_ref, hn_ref, cn_ref, xg_ref):
    """Non-final layer: emits the (T, B, H) hidden sequence for the next layer."""
    _input_projection(x_ref, wih_t_ref, b_ref, xg_ref)

    def store_h(t, h_new):
        out_ref[t] = h_new

    h_fin, c_fin = _recurrence(whh_t_ref, h0_ref, c0_ref, xg_ref, store_h)
    hn_ref[...] = h_fin
    cn_ref[...] = c_fin


def _lstm_fc_kernel(x_ref, wih_t_ref, whh_t_ref, b_ref, h0_ref, c0_ref,
                    wfc_ref, bfc_ref, y_ref, hn_ref, cn_ref, xg_ref, hseq_ref):
    """Final layer fused with Linear(H, 1); hidden sequence never leaves VMEM."""
    _input_projection(x_ref, wih_t_ref, b_ref, xg_ref)

    def store_h(t, h_new):
        hseq_ref[t] = h_new                      # VMEM scratch, no HBM writeback

    h_fin, c_fin = _recurrence(whh_t_ref, h0_ref, c0_ref, xg_ref, store_h)
    hn_ref[...] = h_fin
    cn_ref[...] = c_fin

    # Fused FC: y[t, b] = sum_h hseq[t, b, h] * w_fc[h] + b_fc
    # (VPU multiply + cross-lane reduce; avoids an (N, 1) lane-sparse MXU matmul
    #  and a second pallas_call re-reading (T, B, H) from HBM.)
    H = hseq_ref.shape[-1]
    w_fc = wfc_ref[...].reshape(1, 1, H)
    y_ref[...] = jnp.sum(hseq_ref[...] * w_fc, axis=-1) + bfc_ref[...]


# ---------------------------------------------------------------------------
# Wrappers
# ---------------------------------------------------------------------------

def lstm_layer(x_tbf, w_ih_t, w_hh_t, b, h0, c0):
    T, B, F = x_tbf.shape
    H = h0.shape[-1]
    G = 4 * H
    cost = pl.CostEstimate(
        flops=2 * T * B * (F + H) * G,
        transcendentals=5 * T * B * H,
        bytes_accessed=4 * (x_tbf.size + w_ih_t.size + w_hh_t.size + b.size
                            + 2 * h0.size + T * B * H + 2 * B * H))
    return pl.pallas_call(
        _lstm_layer_kernel,
        out_shape=(jax.ShapeDtypeStruct((T, B, H), jnp.float32),
                   jax.ShapeDtypeStruct((B, H), jnp.float32),
                   jax.ShapeDtypeStruct((B, H), jnp.float32)),
        in_specs=[_VMEM_SPEC] * 6,
        out_specs=(_VMEM_SPEC,) * 3,
        scratch_shapes=[pltpu.VMEM((T, B, G), jnp.float32)],
        cost_estimate=cost,
    )(x_tbf, w_ih_t, w_hh_t, b, h0, c0)


def lstm_fc_layer(x_tbf, w_ih_t, w_hh_t, b, h0, c0, w_fc, b_fc):
    T, B, F = x_tbf.shape
    H = h0.shape[-1]
    G = 4 * H
    cost = pl.CostEstimate(
        flops=2 * T * B * (F + H) * G + 2 * T * B * H,
        transcendentals=5 * T * B * H,
        bytes_accessed=4 * (x_tbf.size + w_ih_t.size + w_hh_t.size + b.size
                            + 2 * h0.size + w_fc.size + T * B + 2 * B * H))
    return pl.pallas_call(
        _lstm_fc_kernel,
        out_shape=(jax.ShapeDtypeStruct((T, B), jnp.float32),      # fc output
                   jax.ShapeDtypeStruct((B, H), jnp.float32),       # h_n
                   jax.ShapeDtypeStruct((B, H), jnp.float32)),      # c_n
        in_specs=[_VMEM_SPEC] * 8,
        out_specs=(_VMEM_SPEC,) * 3,
        scratch_shapes=[pltpu.VMEM((T, B, G), jnp.float32),         # input projection
                        pltpu.VMEM((T, B, H), jnp.float32)],        # hidden sequence
        cost_estimate=cost,
    )(x_tbf, w_ih_t, w_hh_t, b, h0, c0, w_fc, b_fc)


@functools.partial(jax.jit, static_argnames=("num_layers",))
def general_lstm_forward(x, params, h0, c0, *, num_layers):
    """Forward pass of GeneralLSTM.  x: (B, T, F); h0, c0: (L, B, H)."""
    x_tbf = jnp.transpose(x, (1, 0, 2)).astype(jnp.float32)   # (T, B, F)

    h_finals, c_finals = [], []
    layer_in = x_tbf
    # TODO(synk): for num_layers > 1, fuse all layers (and a T-chunked grid for long
    # sequences / v7x's 64 MiB VMEM) into a single kernel so inter-layer activations
    # never round-trip through HBM.
    y = None
    for l in range(num_layers):
        p = params["lstm"][l]
        w_ih_t = jnp.asarray(p["w_ih"], jnp.float32).T          # (F, 4H), folded by XLA
        w_hh_t = jnp.asarray(p["w_hh"], jnp.float32).T          # (H, 4H)
        b = (p["b_ih"] + p["b_hh"]).reshape(1, -1).astype(jnp.float32)   # (1, 4H)
        if l == num_layers - 1:
            y, h_n, c_n = lstm_fc_layer(layer_in, w_ih_t, w_hh_t, b,
                                        h0[l], c0[l],
                                        params["fc"]["w"], params["fc"]["b"])
        else:
            layer_out, h_n, c_n = lstm_layer(layer_in, w_ih_t, w_hh_t, b,
                                             h0[l], c0[l])
            layer_in = layer_out
        h_finals.append(h_n)
        c_finals.append(c_n)

    out = jnp.transpose(y, (1, 0))[..., None]                   # (B, T, 1)
    h_n = jnp.stack(h_finals, axis=0)                           # (L, B, H)
    c_n = jnp.stack(c_finals, axis=0)
    return out, (h_n, c_n)


# ---------------------------------------------------------------------------
# Parameter init (deterministic, PyTorch-style uniform(-1/sqrt(H), 1/sqrt(H)))
# ---------------------------------------------------------------------------

def init_params(key, input_size, hidden, num_layers):
    scale = 1.0 / jnp.sqrt(jnp.float32(hidden))
    params = {"lstm": [], "fc": {}}
    for l in range(num_layers):
        in_dim = input_size if l == 0 else hidden
        key, k1, k2, k3, k4 = jax.random.split(key, 5)
        params["lstm"].append({
            "w_ih": jax.random.uniform(k1, (4 * hidden, in_dim),
                                       jnp.float32, -scale, scale),
            "w_hh": jax.random.uniform(k2, (4 * hidden, hidden),
                                       jnp.float32, -scale, scale),
            "b_ih": jax.random.uniform(k3, (4 * hidden,),
                                       jnp.float32, -scale, scale),
            "b_hh": jax.random.uniform(k4, (4 * hidden,),
                                       jnp.float32, -scale, scale),
        })
    key, k5, k6 = jax.random.split(key, 3)
    params["fc"]["w"] = jax.random.uniform(k5, (1, hidden),
                                           jnp.float32, -scale, scale)
    params["fc"]["b"] = jax.random.uniform(k6, (1, 1),
                                           jnp.float32, -scale, scale)
    return params


# ---------------------------------------------------------------------------
# Pure-JAX reference (sanity check)
# ---------------------------------------------------------------------------

def reference_forward(x, params, h0, c0, num_layers):
    B, T, _ = x.shape
    layer_in = x
    h_fs, c_fs = [], []
    for l in range(num_layers):
        p = params["lstm"][l]
        H = p["w_hh"].shape[1]
        h = h0[l]
        c = c0[l]
        outs = []
        for t in range(T):
            g = (layer_in[:, t, :] @ p["w_ih"].T + p["b_ih"]
                 + h @ p["w_hh"].T + p["b_hh"])
            i = jax.nn.sigmoid(g[:, 0 * H:1 * H])
            f = jax.nn.sigmoid(g[:, 1 * H:2 * H])
            gg = jnp.tanh(g[:, 2 * H:3 * H])
            o = jax.nn.sigmoid(g[:, 3 * H:4 * H])
            c = f * c + i * gg
            h = o * jnp.tanh(c)
            outs.append(h)
        layer_in = jnp.stack(outs, axis=1)
        h_fs.append(h)
        c_fs.append(c)
    out = layer_in @ params["fc"]["w"].T + params["fc"]["b"][0]
    return out, (jnp.stack(h_fs, 0), jnp.stack(c_fs, 0))


# ---------------------------------------------------------------------------
# Main
# ---------------------------------------------------------------------------

if __name__ == "__main__":
    batch_size = 2
    seq_len = 8
    input_size = 4
    num_hidden_units = 32
    num_layers = 1

    key = jax.random.PRNGKey(0)
    key, kx, kp = jax.random.split(key, 3)

    x = jax.random.normal(kx, (batch_size, seq_len, input_size), jnp.float32)
    params = init_params(kp, input_size, num_hidden_units, num_layers)

    # init_hidden: zeros (the (c0, h0) swap in the module is a no-op since both
    # are zeros).
    h0 = jnp.zeros((num_layers, batch_size, num_hidden_units), jnp.float32)
    c0 = jnp.zeros((num_layers, batch_size, num_hidden_units), jnp.float32)

    out, (h_n, c_n) = general_lstm_forward(x, params, h0, c0,
                                           num_layers=num_layers)
    jax.block_until_ready((out, h_n, c_n))

    # Sanity check against a pure-JAX reference.
    ref_out, (ref_h, ref_c) = reference_forward(x, params, h0, c0, num_layers)
    assert out.shape == (batch_size, seq_len, 1)
    assert h_n.shape == (num_layers, batch_size, num_hidden_units)
    assert c_n.shape == (num_layers, batch_size, num_hidden_units)
    assert jnp.allclose(out, ref_out, atol=1e-4), "fc output mismatch"
    assert jnp.allclose(h_n, ref_h, atol=1e-4), "h_n mismatch"
    assert jnp.allclose(c_n, ref_c, atol=1e-4), "c_n mismatch"

    print("KERNEL_OK")
</pallas_src>

<mosaic_0001>
module attributes {stable_mosaic.version = 11 : i64} {
  func.func @_lstm_fc_kernel(%arg0: memref<8x2x4xf32, #tpu.memory_space<vmem>>, %arg1: memref<4x128xf32, #tpu.memory_space<vmem>>, %arg2: memref<32x128xf32, #tpu.memory_space<vmem>>, %arg3: memref<1x128xf32, #tpu.memory_space<vmem>>, %arg4: memref<2x32xf32, #tpu.memory_space<vmem>>, %arg5: memref<2x32xf32, #tpu.memory_space<vmem>>, %arg6: memref<1x32xf32, #tpu.memory_space<vmem>>, %arg7: memref<1x1xf32, #tpu.memory_space<vmem>>, %arg8: memref<8x2xf32, #tpu.memory_space<vmem>>, %arg9: memref<2x32xf32, #tpu.memory_space<vmem>>, %arg10: memref<2x32xf32, #tpu.memory_space<vmem>>, %arg11: memref<8x2x128xf32, #tpu.memory_space<vmem>>, %arg12: memref<8x2x32xf32, #tpu.memory_space<vmem>>) attributes {dimension_semantics = [], scalar_prefetch = 0 : i64, scratch_operands = 2 : i64, tpu.core_type = #tpu.core_type<tc>} {
    %c0 = arith.constant 0 : index
    %c0_0 = arith.constant 0 : index
    %c0_1 = arith.constant 0 : index
    %0 = vector.load %arg0[%c0, %c0_0, %c0_1] : memref<8x2x4xf32, #tpu.memory_space<vmem>>, vector<8x2x4xf32>
    %1 = vector.shape_cast %0 : vector<8x2x4xf32> to vector<16x4xf32>
    %c0_2 = arith.constant 0 : index
    %c0_3 = arith.constant 0 : index
    %2 = vector.load %arg1[%c0_2, %c0_3] : memref<4x128xf32, #tpu.memory_space<vmem>>, vector<4x128xf32>
    %cst = arith.constant dense<0.000000e+00> : vector<16x128xf32>
    %3 = tpu.matmul %1, %2, %cst {dimension_numbers = #tpu.dot_dimension_numbers<[1], [0], [0], [1], [0, 0, 1, 1], [], []>} : vector<16x4xf32>, vector<4x128xf32>, vector<16x128xf32> -> vector<16x128xf32>
    %c0_4 = arith.constant 0 : index
    %c0_5 = arith.constant 0 : index
    %4 = vector.load %arg3[%c0_4, %c0_5] : memref<1x128xf32, #tpu.memory_space<vmem>>, vector<1x128xf32>
    %5 = vector.broadcast %4 : vector<1x128xf32> to vector<16x128xf32>
    %6 = arith.addf %3, %5 : vector<16x128xf32>
    %7 = vector.shape_cast %6 : vector<16x128xf32> to vector<8x2x128xf32>
    %c0_6 = arith.constant 0 : index
    %c0_7 = arith.constant 0 : index
    %c0_8 = arith.constant 0 : index
    %8 = vector.load %arg11[%c0_6, %c0_7, %c0_8] : memref<8x2x128xf32, #tpu.memory_space<vmem>>, vector<8x2x128xf32>
    tpu.vector_store %arg11[%c0_6, %c0_7, %c0_8], %7 {strides = array<i32>} : memref<8x2x128xf32, #tpu.memory_space<vmem>>, vector<8x2x128xf32>,
    %c0_9 = arith.constant 0 : index
    %c0_10 = arith.constant 0 : index
    %9 = vector.load %arg2[%c0_9, %c0_10] : memref<32x128xf32, #tpu.memory_space<vmem>>, vector<32x128xf32>
    %c0_11 = arith.constant 0 : index
    %c0_12 = arith.constant 0 : index
    %10 = vector.load %arg4[%c0_11, %c0_12] : memref<2x32xf32, #tpu.memory_space<vmem>>, vector<2x32xf32>
    %c0_13 = arith.constant 0 : index
    %c0_14 = arith.constant 0 : index
    %11 = vector.load %arg5[%c0_13, %c0_14] : memref<2x32xf32, #tpu.memory_space<vmem>>, vector<2x32xf32>
    %c0_i32 = arith.constant 0 : i32
    %12 = arith.index_cast %c0_i32 : i32 to index
    %c0_15 = arith.constant 0 : index
    %c0_16 = arith.constant 0 : index
    %13 = vector.load %arg11[%12, %c0_15, %c0_16] : memref<8x2x128xf32, #tpu.memory_space<vmem>>, vector<1x2x128xf32>
    %14 = vector.shape_cast %13 : vector<1x2x128xf32> to vector<2x128xf32>
    %cst_17 = arith.constant dense<0.000000e+00> : vector<2x128xf32>
    %15 = tpu.matmul %10, %9, %cst_17 {dimension_numbers = #tpu.dot_dimension_numbers<[1], [0], [0], [1], [0, 0, 1, 1], [], []>} : vector<2x32xf32>, vector<32x128xf32>, vector<2x128xf32> -> vector<2x128xf32>
    %16 = arith.addf %14, %15 : vector<2x128xf32>
    %17 = arith.negf %16 : vector<2x128xf32>
    %18 = math.exp %17 : vector<2x128xf32>
    %cst_18 = arith.constant 1.000000e+00 : f32
    %19 = vector.broadcast %cst_18 : f32 to vector<2x128xf32>
    %20 = arith.addf %19, %18 : vector<2x128xf32>
    %21 = arith.divf %19, %20 : vector<2x128xf32>
    %22 = math.tanh %16 : vector<2x128xf32>
    %23 = vector.extract_strided_slice %21 {offsets = [0, 0], sizes = [2, 32], strides = [1, 1]} : vector<2x128xf32> to vector<2x32xf32>
    %24 = vector.extract_strided_slice %21 {offsets = [0, 32], sizes = [2, 32], strides = [1, 1]} : vector<2x128xf32> to vector<2x32xf32>
    %25 = vector.extract_strided_slice %22 {offsets = [0, 64], sizes = [2, 32], strides = [1, 1]} : vector<2x128xf32> to vector<2x32xf32>
    %26 = vector.extract_strided_slice %21 {offsets = [0, 96], sizes = [2, 32], strides = [1, 1]} : vector<2x128xf32> to vector<2x32xf32>
    %27 = arith.mulf %24, %11 : vector<2x32xf32>
    %28 = arith.mulf %23, %25 : vector<2x32xf32>
    %29 = arith.addf %27, %28 : vector<2x32xf32>
    %30 = math.tanh %29 : vector<2x32xf32>
    %31 = arith.mulf %26, %30 : vector<2x32xf32>
    %32 = arith.index_cast %c0_i32 : i32 to index
    %c0_19 = arith.constant 0 : index
    %c0_20 = arith.constant 0 : index
    %33 = vector.load %arg12[%32, %c0_19, %c0_20] : memref<8x2x32xf32, #tpu.memory_space<vmem>>, vector<1x2x32xf32>
    %34 = vector.shape_cast %33 : vector<1x2x32xf32> to vector<2x32xf32>
    %35 = vector.shape_cast %31 : vector<2x32xf32> to vector<1x2x32xf32>
    tpu.vector_store %arg12[%32, %c0_19, %c0_20], %35 {strides = array<i32>} : memref<8x2x32xf32, #tpu.memory_space<vmem>>, vector<1x2x32xf32>,
    %c1_i32 = arith.constant 1 : i32
    %36 = arith.index_cast %c1_i32 : i32 to index
    %c0_21 = arith.constant 0 : index
    %c0_22 = arith.constant 0 : index
    %37 = vector.load %arg11[%36, %c0_21, %c0_22] : memref<8x2x128xf32, #tpu.memory_space<vmem>>, vector<1x2x128xf32>
    %38 = vector.shape_cast %37 : vector<1x2x128xf32> to vector<2x128xf32>
    %cst_23 = arith.constant dense<0.000000e+00> : vector<2x128xf32>
    %39 = tpu.matmul %31, %9, %cst_23 {dimension_numbers = #tpu.dot_dimension_numbers<[1], [0], [0], [1], [0, 0, 1, 1], [], []>} : vector<2x32xf32>, vector<32x128xf32>, vector<2x128xf32> -> vector<2x128xf32>
    %40 = arith.addf %38, %39 : vector<2x128xf32>
    %41 = arith.negf %40 : vector<2x128xf32>
    %42 = math.exp %41 : vector<2x128xf32>
    %cst_24 = arith.constant 1.000000e+00 : f32
    %43 = vector.broadcast %cst_24 : f32 to vector<2x128xf32>
    %44 = arith.addf %43, %42 : vector<2x128xf32>
    %45 = arith.divf %43, %44 : vector<2x128xf32>
    %46 = math.tanh %40 : vector<2x128xf32>
    %47 = vector.extract_strided_slice %45 {offsets = [0, 0], sizes = [2, 32], strides = [1, 1]} : vector<2x128xf32> to vector<2x32xf32>
    %48 = vector.extract_strided_slice %45 {offsets = [0, 32], sizes = [2, 32], strides = [1, 1]} : vector<2x128xf32> to vector<2x32xf32>
    %49 = vector.extract_strided_slice %46 {offsets = [0, 64], sizes = [2, 32], strides = [1, 1]} : vector<2x128xf32> to vector<2x32xf32>
    %50 = vector.extract_strided_slice %45 {offsets = [0, 96], sizes = [2, 32], strides = [1, 1]} : vector<2x128xf32> to vector<2x32xf32>
    %51 = arith.mulf %48, %29 : vector<2x32xf32>
    %52 = arith.mulf %47, %49 : vector<2x32xf32>
    %53 = arith.addf %51, %52 : vector<2x32xf32>
    %54 = math.tanh %53 : vector<2x32xf32>
    %55 = arith.mulf %50, %54 : vector<2x32xf32>
    %56 = arith.index_cast %c1_i32 : i32 to index
    %c0_25 = arith.constant 0 : index
    %c0_26 = arith.constant 0 : index
    %57 = vector.load %arg12[%56, %c0_25, %c0_26] : memref<8x2x32xf32, #tpu.memory_space<vmem>>, vector<1x2x32xf32>
    %58 = vector.shape_cast %57 : vector<1x2x32xf32> to vector<2x32xf32>
    %59 = vector.shape_cast %55 : vector<2x32xf32> to vector<1x2x32xf32>
    tpu.vector_store %arg12[%56, %c0_25, %c0_26], %59 {strides = array<i32>} : memref<8x2x32xf32, #tpu.memory_space<vmem>>, vector<1x2x32xf32>,
    %c2_i32 = arith.constant 2 : i32
    %60 = arith.index_cast %c2_i32 : i32 to index
    %c0_27 = arith.constant 0 : index
    %c0_28 = arith.constant 0 : index
    %61 = vector.load %arg11[%60, %c0_27, %c0_28] : memref<8x2x128xf32, #tpu.memory_space<vmem>>, vector<1x2x128xf32>
    %62 = vector.shape_cast %61 : vector<1x2x128xf32> to vector<2x128xf32>
    %cst_29 = arith.constant dense<0.000000e+00> : vector<2x128xf32>
    %63 = tpu.matmul %55, %9, %cst_29 {dimension_numbers = #tpu.dot_dimension_numbers<[1], [0], [0], [1], [0, 0, 1, 1], [], []>} : vector<2x32xf32>, vector<32x128xf32>, vector<2x128xf32> -> vector<2x128xf32>
    %64 = arith.addf %62, %63 : vector<2x128xf32>
    %65 = arith.negf %64 : vector<2x128xf32>
    %66 = math.exp %65 : vector<2x128xf32>
    %cst_30 = arith.constant 1.000000e+00 : f32
    %67 = vector.broadcast %cst_30 : f32 to vector<2x128xf32>
    %68 = arith.addf %67, %66 : vector<2x128xf32>
    %69 = arith.divf %67, %68 : vector<2x128xf32>
    %70 = math.tanh %64 : vector<2x128xf32>
    %71 = vector.extract_strided_slice %69 {offsets = [0, 0], sizes = [2, 32], strides = [1, 1]} : vector<2x128xf32> to vector<2x32xf32>
    %72 = vector.extract_strided_slice %69 {offsets = [0, 32], sizes = [2, 32], strides = [1, 1]} : vector<2x128xf32> to vector<2x32xf32>
    %73 = vector.extract_strided_slice %70 {offsets = [0, 64], sizes = [2, 32], strides = [1, 1]} : vector<2x128xf32> to vector<2x32xf32>
    %74 = vector.extract_strided_slice %69 {offsets = [0, 96], sizes = [2, 32], strides = [1, 1]} : vector<2x128xf32> to vector<2x32xf32>
    %75 = arith.mulf %72, %53 : vector<2x32xf32>
    %76 = arith.mulf %71, %73 : vector<2x32xf32>
    %77 = arith.addf %75, %76 : vector<2x32xf32>
    %78 = math.tanh %77 : vector<2x32xf32>
    %79 = arith.mulf %74, %78 : vector<2x32xf32>
    %80 = arith.index_cast %c2_i32 : i32 to index
    %c0_31 = arith.constant 0 : index
    %c0_32 = arith.constant 0 : index
    %81 = vector.load %arg12[%80, %c0_31, %c0_32] : memref<8x2x32xf32, #tpu.memory_space<vmem>>, vector<1x2x32xf32>
    %82 = vector.shape_cast %81 : vector<1x2x32xf32> to vector<2x32xf32>
    %83 = vector.shape_cast %79 : vector<2x32xf32> to vector<1x2x32xf32>
    tpu.vector_store %arg12[%80, %c0_31, %c0_32], %83 {strides = array<i32>} : memref<8x2x32xf32, #tpu.memory_space<vmem>>, vector<1x2x32xf32>,
    %c3_i32 = arith.constant 3 : i32
    %84 = arith.index_cast %c3_i32 : i32 to index
    %c0_33 = arith.constant 0 : index
    %c0_34 = arith.constant 0 : index
    %85 = vector.load %arg11[%84, %c0_33, %c0_34] : memref<8x2x128xf32, #tpu.memory_space<vmem>>, vector<1x2x128xf32>
    %86 = vector.shape_cast %85 : vector<1x2x128xf32> to vector<2x128xf32>
    %cst_35 = arith.constant dense<0.000000e+00> : vector<2x128xf32>
    %87 = tpu.matmul %79, %9, %cst_35 {dimension_numbers = #tpu.dot_dimension_numbers<[1], [0], [0], [1], [0, 0, 1, 1], [], []>} : vector<2x32xf32>, vector<32x128xf32>, vector<2x128xf32> -> vector<2x128xf32>
    %88 = arith.addf %86, %87 : vector<2x128xf32>
    %89 = arith.negf %88 : vector<2x128xf32>
    %90 = math.exp %89 : vector<2x128xf32>
    %cst_36 = arith.constant 1.000000e+00 : f32
    %91 = vector.broadcast %cst_36 : f32 to vector<2x128xf32>
    %92 = arith.addf %91, %90 : vector<2x128xf32>
    %93 = arith.divf %91, %92 : vector<2x128xf32>
    %94 = math.tanh %88 : vector<2x128xf32>
    %95 = vector.extract_strided_slice %93 {offsets = [0, 0], sizes = [2, 32], strides = [1, 1]} : vector<2x128xf32> to vector<2x32xf32>
    %96 = vector.extract_strided_slice %93 {offsets = [0, 32], sizes = [2, 32], strides = [1, 1]} : vector<2x128xf32> to vector<2x32xf32>
    %97 = vector.extract_strided_slice %94 {offsets = [0, 64], sizes = [2, 32], strides = [1, 1]} : vector<2x128xf32> to vector<2x32xf32>
    %98 = vector.extract_strided_slice %93 {offsets = [0, 96], sizes = [2, 32], strides = [1, 1]} : vector<2x128xf32> to vector<2x32xf32>
    %99 = arith.mulf %96, %77 : vector<2x32xf32>
    %100 = arith.mulf %95, %97 : vector<2x32xf32>
    %101 = arith.addf %99, %100 : vector<2x32xf32>
    %102 = math.tanh %101 : vector<2x32xf32>
    %103 = arith.mulf %98, %102 : vector<2x32xf32>
    %104 = arith.index_cast %c3_i32 : i32 to index
    %c0_37 = arith.constant 0 : index
    %c0_38 = arith.constant 0 : index
    %105 = vector.load %arg12[%104, %c0_37, %c0_38] : memref<8x2x32xf32, #tpu.memory_space<vmem>>, vector<1x2x32xf32>
    %106 = vector.shape_cast %105 : vector<1x2x32xf32> to vector<2x32xf32>
    %107 = vector.shape_cast %103 : vector<2x32xf32> to vector<1x2x32xf32>
    tpu.vector_store %arg12[%104, %c0_37, %c0_38], %107 {strides = array<i32>} : memref<8x2x32xf32, #tpu.memory_space<vmem>>, vector<1x2x32xf32>,
    %c4_i32 = arith.constant 4 : i32
    %108 = arith.index_cast %c4_i32 : i32 to index
    %c0_39 = arith.constant 0 : index
    %c0_40 = arith.constant 0 : index
    %109 = vector.load %arg11[%108, %c0_39, %c0_40] : memref<8x2x128xf32, #tpu.memory_space<vmem>>, vector<1x2x128xf32>
    %110 = vector.shape_cast %109 : vector<1x2x128xf32> to vector<2x128xf32>
    %cst_41 = arith.constant dense<0.000000e+00> : vector<2x128xf32>
    %111 = tpu.matmul %103, %9, %cst_41 {dimension_numbers = #tpu.dot_dimension_numbers<[1], [0], [0], [1], [0, 0, 1, 1], [], []>} : vector<2x32xf32>, vector<32x128xf32>, vector<2x128xf32> -> vector<2x128xf32>
    %112 = arith.addf %110, %111 : vector<2x128xf32>
    %113 = arith.negf %112 : vector<2x128xf32>
    %114 = math.exp %113 : vector<2x128xf32>
    %cst_42 = arith.constant 1.000000e+00 : f32
    %115 = vector.broadcast %cst_42 : f32 to vector<2x128xf32>
    %116 = arith.addf %115, %114 : vector<2x128xf32>
    %117 = arith.divf %115, %116 : vector<2x128xf32>
    %118 = math.tanh %112 : vector<2x128xf32>
    %119 = vector.extract_strided_slice %117 {offsets = [0, 0], sizes = [2, 32], strides = [1, 1]} : vector<2x128xf32> to vector<2x32xf32>
    %120 = vector.extract_strided_slice %117 {offsets = [0, 32], sizes = [2, 32], strides = [1, 1]} : vector<2x128xf32> to vector<2x32xf32>
    %121 = vector.extract_strided_slice %118 {offsets = [0, 64], sizes = [2, 32], strides = [1, 1]} : vector<2x128xf32> to vector<2x32xf32>
    %122 = vector.extract_strided_slice %117 {offsets = [0, 96], sizes = [2, 32], strides = [1, 1]} : vector<2x128xf32> to vector<2x32xf32>
    %123 = arith.mulf %120, %101 : vector<2x32xf32>
    %124 = arith.mulf %119, %121 : vector<2x32xf32>
    %125 = arith.addf %123, %124 : vector<2x32xf32>
    %126 = math.tanh %125 : vector<2x32xf32>
    %127 = arith.mulf %122, %126 : vector<2x32xf32>
    %128 = arith.index_cast %c4_i32 : i32 to index
    %c0_43 = arith.constant 0 : index
    %c0_44 = arith.constant 0 : index
    %129 = vector.load %arg12[%128, %c0_43, %c0_44] : memref<8x2x32xf32, #tpu.memory_space<vmem>>, vector<1x2x32xf32>
    %130 = vector.shape_cast %129 : vector<1x2x32xf32> to vector<2x32xf32>
    %131 = vector.shape_cast %127 : vector<2x32xf32> to vector<1x2x32xf32>
    tpu.vector_store %arg12[%128, %c0_43, %c0_44], %131 {strides = array<i32>} : memref<8x2x32xf32, #tpu.memory_space<vmem>>, vector<1x2x32xf32>,
    %c5_i32 = arith.constant 5 : i32
    %132 = arith.index_cast %c5_i32 : i32 to index
    %c0_45 = arith.constant 0 : index
    %c0_46 = arith.constant 0 : index
    %133 = vector.load %arg11[%132, %c0_45, %c0_46] : memref<8x2x128xf32, #tpu.memory_space<vmem>>, vector<1x2x128xf32>
    %134 = vector.shape_cast %133 : vector<1x2x128xf32> to vector<2x128xf32>
    %cst_47 = arith.constant dense<0.000000e+00> : vector<2x128xf32>
    %135 = tpu.matmul %127, %9, %cst_47 {dimension_numbers = #tpu.dot_dimension_numbers<[1], [0], [0], [1], [0, 0, 1, 1], [], []>} : vector<2x32xf32>, vector<32x128xf32>, vector<2x128xf32> -> vector<2x128xf32>
    %136 = arith.addf %134, %135 : vector<2x128xf32>
    %137 = arith.negf %136 : vector<2x128xf32>
    %138 = math.exp %137 : vector<2x128xf32>
    %cst_48 = arith.constant 1.000000e+00 : f32
    %139 = vector.broadcast %cst_48 : f32 to vector<2x128xf32>
    %140 = arith.addf %139, %138 : vector<2x128xf32>
    %141 = arith.divf %139, %140 : vector<2x128xf32>
    %142 = math.tanh %136 : vector<2x128xf32>
    %143 = vector.extract_strided_slice %141 {offsets = [0, 0], sizes = [2, 32], strides = [1, 1]} : vector<2x128xf32> to vector<2x32xf32>
    %144 = vector.extract_strided_slice %141 {offsets = [0, 32], sizes = [2, 32], strides = [1, 1]} : vector<2x128xf32> to vector<2x32xf32>
    %145 = vector.extract_strided_slice %142 {offsets = [0, 64], sizes = [2, 32], strides = [1, 1]} : vector<2x128xf32> to vector<2x32xf32>
    %146 = vector.extract_strided_slice %141 {offsets = [0, 96], sizes = [2, 32], strides = [1, 1]} : vector<2x128xf32> to vector<2x32xf32>
    %147 = arith.mulf %144, %125 : vector<2x32xf32>
    %148 = arith.mulf %143, %145 : vector<2x32xf32>
    %149 = arith.addf %147, %148 : vector<2x32xf32>
    %150 = math.tanh %149 : vector<2x32xf32>
    %151 = arith.mulf %146, %150 : vector<2x32xf32>
    %152 = arith.index_cast %c5_i32 : i32 to index
    %c0_49 = arith.constant 0 : index
    %c0_50 = arith.constant 0 : index
    %153 = vector.load %arg12[%152, %c0_49, %c0_50] : memref<8x2x32xf32, #tpu.memory_space<vmem>>, vector<1x2x32xf32>
    %154 = vector.shape_cast %153 : vector<1x2x32xf32> to vector<2x32xf32>
    %155 = vector.shape_cast %151 : vector<2x32xf32> to vector<1x2x32xf32>
    tpu.vector_store %arg12[%152, %c0_49, %c0_50], %155 {strides = array<i32>} : memref<8x2x32xf32, #tpu.memory_space<vmem>>, vector<1x2x32xf32>,
    %c6_i32 = arith.constant 6 : i32
    %156 = arith.index_cast %c6_i32 : i32 to index
    %c0_51 = arith.constant 0 : index
    %c0_52 = arith.constant 0 : index
    %157 = vector.load %arg11[%156, %c0_51, %c0_52] : memref<8x2x128xf32, #tpu.memory_space<vmem>>, vector<1x2x128xf32>
    %158 = vector.shape_cast %157 : vector<1x2x128xf32> to vector<2x128xf32>
    %cst_53 = arith.constant dense<0.000000e+00> : vector<2x128xf32>
    %159 = tpu.matmul %151, %9, %cst_53 {dimension_numbers = #tpu.dot_dimension_numbers<[1], [0], [0], [1], [0, 0, 1, 1], [], []>} : vector<2x32xf32>, vector<32x128xf32>, vector<2x128xf32> -> vector<2x128xf32>
    %160 = arith.addf %158, %159 : vector<2x128xf32>
    %161 = arith.negf %160 : vector<2x128xf32>
    %162 = math.exp %161 : vector<2x128xf32>
    %cst_54 = arith.constant 1.000000e+00 : f32
    %163 = vector.broadcast %cst_54 : f32 to vector<2x128xf32>
    %164 = arith.addf %163, %162 : vector<2x128xf32>
    %165 = arith.divf %163, %164 : vector<2x128xf32>
    %166 = math.tanh %160 : vector<2x128xf32>
    %167 = vector.extract_strided_slice %165 {offsets = [0, 0], sizes = [2, 32], strides = [1, 1]} : vector<2x128xf32> to vector<2x32xf32>
    %168 = vector.extract_strided_slice %165 {offsets = [0, 32], sizes = [2, 32], strides = [1, 1]} : vector<2x128xf32> to vector<2x32xf32>
    %169 = vector.extract_strided_slice %166 {offsets = [0, 64], sizes = [2, 32], strides = [1, 1]} : vector<2x128xf32> to vector<2x32xf32>
    %170 = vector.extract_strided_slice %165 {offsets = [0, 96], sizes = [2, 32], strides = [1, 1]} : vector<2x128xf32> to vector<2x32xf32>
    %171 = arith.mulf %168, %149 : vector<2x32xf32>
    %172 = arith.mulf %167, %169 : vector<2x32xf32>
    %173 = arith.addf %171, %172 : vector<2x32xf32>
    %174 = math.tanh %173 : vector<2x32xf32>
    %175 = arith.mulf %170, %174 : vector<2x32xf32>
    %176 = arith.index_cast %c6_i32 : i32 to index
    %c0_55 = arith.constant 0 : index
    %c0_56 = arith.constant 0 : index
    %177 = vector.load %arg12[%176, %c0_55, %c0_56] : memref<8x2x32xf32, #tpu.memory_space<vmem>>, vector<1x2x32xf32>
    %178 = vector.shape_cast %177 : vector<1x2x32xf32> to vector<2x32xf32>
    %179 = vector.shape_cast %175 : vector<2x32xf32> to vector<1x2x32xf32>
    tpu.vector_store %arg12[%176, %c0_55, %c0_56], %179 {strides = array<i32>} : memref<8x2x32xf32, #tpu.memory_space<vmem>>, vector<1x2x32xf32>,
    %c7_i32 = arith.constant 7 : i32
    %180 = arith.index_cast %c7_i32 : i32 to index
    %c0_57 = arith.constant 0 : index
    %c0_58 = arith.constant 0 : index
    %181 = vector.load %arg11[%180, %c0_57, %c0_58] : memref<8x2x128xf32, #tpu.memory_space<vmem>>, vector<1x2x128xf32>
    %182 = vector.shape_cast %181 : vector<1x2x128xf32> to vector<2x128xf32>
    %cst_59 = arith.constant dense<0.000000e+00> : vector<2x128xf32>
    %183 = tpu.matmul %175, %9, %cst_59 {dimension_numbers = #tpu.dot_dimension_numbers<[1], [0], [0], [1], [0, 0, 1, 1], [], []>} : vector<2x32xf32>, vector<32x128xf32>, vector<2x128xf32> -> vector<2x128xf32>
    %184 = arith.addf %182, %183 : vector<2x128xf32>
    %185 = arith.negf %184 : vector<2x128xf32>
    %186 = math.exp %185 : vector<2x128xf32>
    %cst_60 = arith.constant 1.000000e+00 : f32
    %187 = vector.broadcast %cst_60 : f32 to vector<2x128xf32>
    %188 = arith.addf %187, %186 : vector<2x128xf32>
    %189 = arith.divf %187, %188 : vector<2x128xf32>
    %190 = math.tanh %184 : vector<2x128xf32>
    %191 = vector.extract_strided_slice %189 {offsets = [0, 0], sizes = [2, 32], strides = [1, 1]} : vector<2x128xf32> to vector<2x32xf32>
    %192 = vector.extract_strided_slice %189 {offsets = [0, 32], sizes = [2, 32], strides = [1, 1]} : vector<2x128xf32> to vector<2x32xf32>
    %193 = vector.extract_strided_slice %190 {offsets = [0, 64], sizes = [2, 32], strides = [1, 1]} : vector<2x128xf32> to vector<2x32xf32>
    %194 = vector.extract_strided_slice %189 {offsets = [0, 96], sizes = [2, 32], strides = [1, 1]} : vector<2x128xf32> to vector<2x32xf32>
    %195 = arith.mulf %192, %173 : vector<2x32xf32>
    %196 = arith.mulf %191, %193 : vector<2x32xf32>
    %197 = arith.addf %195, %196 : vector<2x32xf32>
    %198 = math.tanh %197 : vector<2x32xf32>
    %199 = arith.mulf %194, %198 : vector<2x32xf32>
    %200 = arith.index_cast %c7_i32 : i32 to index
    %c0_61 = arith.constant 0 : index
    %c0_62 = arith.constant 0 : index
    %201 = vector.load %arg12[%200, %c0_61, %c0_62] : memref<8x2x32xf32, #tpu.memory_space<vmem>>, vector<1x2x32xf32>
    %202 = vector.shape_cast %201 : vector<1x2x32xf32> to vector<2x32xf32>
    %203 = vector.shape_cast %199 : vector<2x32xf32> to vector<1x2x32xf32>
    tpu.vector_store %arg12[%200, %c0_61, %c0_62], %203 {strides = array<i32>} : memref<8x2x32xf32, #tpu.memory_space<vmem>>, vector<1x2x32xf32>,
    %c8_i32 = arith.constant 8 : i32
    %c0_63 = arith.constant 0 : index
    %c0_64 = arith.constant 0 : index
    %204 = vector.load %arg9[%c0_63, %c0_64] : memref<2x32xf32, #tpu.memory_space<vmem>>, vector<2x32xf32>
    tpu.vector_store %arg9[%c0_63, %c0_64], %199 {strides = array<i32>} : memref<2x32xf32, #tpu.memory_space<vmem>>, vector<2x32xf32>,
    %c0_65 = arith.constant 0 : index
    %c0_66 = arith.constant 0 : index
    %205 = vector.load %arg10[%c0_65, %c0_66] : memref<2x32xf32, #tpu.memory_space<vmem>>, vector<2x32xf32>
    tpu.vector_store %arg10[%c0_65, %c0_66], %197 {strides = array<i32>} : memref<2x32xf32, #tpu.memory_space<vmem>>, vector<2x32xf32>,
    %c0_67 = arith.constant 0 : index
    %c0_68 = arith.constant 0 : index
    %206 = vector.load %arg6[%c0_67, %c0_68] : memref<1x32xf32, #tpu.memory_space<vmem>>, vector<1x32xf32>
    %207 = vector.shape_cast %206 : vector<1x32xf32> to vector<1x1x32xf32>
    %c0_69 = arith.constant 0 : index
    %c0_70 = arith.constant 0 : index
    %c0_71 = arith.constant 0 : index
    %208 = vector.load %arg12[%c0_69, %c0_70, %c0_71] : memref<8x2x32xf32, #tpu.memory_space<vmem>>, vector<8x2x32xf32>
    %209 = vector.broadcast %207 : vector<1x1x32xf32> to vector<8x2x32xf32>
    %210 = arith.mulf %208, %209 : vector<8x2x32xf32>
    %cst_72 = arith.constant dense<0.000000e+00> : vector<8x2xf32>
    %211 = vector.multi_reduction <add>, %210, %cst_72 [2] : vector<8x2x32xf32> to vector<8x2xf32>
    %c0_73 = arith.constant 0 : index
    %c0_74 = arith.constant 0 : index
    %212 = vector.load %arg7[%c0_73, %c0_74] : memref<1x1xf32, #tpu.memory_space<vmem>>, vector<1x1xf32>
    %213 = vector.broadcast %212 : vector<1x1xf32> to vector<8x2xf32>
    %214 = arith.addf %211, %213 : vector<8x2xf32>
    %c0_75 = arith.constant 0 : index
    %c0_76 = arith.constant 0 : index
    %215 = vector.load %arg8[%c0_75, %c0_76] : memref<8x2xf32, #tpu.memory_space<vmem>>, vector<8x2xf32>
    tpu.vector_store %arg8[%c0_75, %c0_76], %214 {strides = array<i32>} : memref<8x2xf32, #tpu.memory_space<vmem>>, vector<8x2xf32>,
    return
  }
}

</mosaic_0001>

<bundles_post_ra>
// kernel: general_lstm_forward.1
= control target key start
LH: loop header
LB: loop body
LE: loop exit
PB: predicated region body
PF: predicated region fallthrough
CT: control target
= control target key end

     0   :  { %s1839_s0 = inlined_call_operand.vmem [shape: f32[8,2,4], index: 0, kind: input, shape index: {}]   ;;  %s1840_s1 = inlined_call_operand.vmem [shape: f32[4,128], index: 1, kind: input, shape index: {}]   ;;  %s1841_s2 = inlined_call_operand.vmem [shape: f32[32,128], index: 2, kind: input, shape index: {}]   ;;  %s1842_s3 = inlined_call_operand.vmem [shape: f32[1,128], index: 3, kind: input, shape index: {}]   ;;  %s1843_s4 = inlined_call_operand.vmem [shape: f32[2,32], index: 4, kind: input, shape index: {}]   ;;  %s1844_s5 = inlined_call_operand.vmem [shape: f32[2,32], index: 5, kind: input, shape index: {}]   ;;  %s1845_s6 = inlined_call_operand.vmem [shape: f32[1,32], index: 6, kind: input, shape index: {}]   ;;  %s1846_s7 = inlined_call_operand.<no memory space> [shape: f32[1,1], index: 7, kind: input, shape index: {}]   ;;  %s1847_s8 = inlined_call_operand.vmem [shape: f32[8,2], index: 8, kind: output, shape index: {0}]   ;;  %s1848_s9 = inlined_call_operand.hbm [shape: f32[2,32], index: 9, kind: output, shape index: {1}]   ;;  %s1849_s10 = inlined_call_operand.hbm [shape: f32[2,32], index: 10, kind: output, shape index: {2}]  }
   0x1   :  { %v16_v0 = vstv %s1846_s7 }
   0x2   :  { %17 = vst [vmem:[#allocation4] sm:$0x1] %v16_v0 }
   0x3   :  { %18 = vsyncpa [#allocation6], 0  ;;  %v44_v1 = vld [vmem:[%s1840_s1] sm:$0xf]  ;;  %vm99_vm0 = vcmask 1043456   ;;  %v65_v3 = vlaneseq  ;;  %v231_v18 = vld [vmem:[%s1841_s2 + $0x8] sm:$0xff] }
   0x4   :  { %v36_v2 = vld [vmem:[%s1839_s0] sm:$0x3]  ;;  %1312 = vmatprep.subr.msk.mxu0 %vm99_vm0, %v44_v1  ;;  %v37_v4 = vld [vmem:[%s1839_s0 + $0x2] sm:$0x3]  ;;  %v38_v5 = vld [vmem:[%s1839_s0 + $0x4] sm:$0x3] }
   0x5   :  { %v39_v6 = vld [vmem:[%s1839_s0 + $0x6] sm:$0x3]  ;;  %1313 = vmatpush3.msk.msra.mxu0 %vm99_vm0, %v44_v1  ;;  %v1660_v7 = vshrl.u32 %v65_v3, 7  ;;  %v40_v8 = vld [vmem:[%s1839_s0 + $0x8] sm:$0x3]  ;;  %v60_v10 = vcombine.low %v36_v2, %v37_v4  ;;  %v232_v19 = vld [vmem:[%s1841_s2 + $0x10] sm:$0xff] }
   0x6   :  { %v230_v9 = vld [vmem:[%s1841_s2] sm:$0xff]  ;;  %v1576_v11 = vmov 1983009808   ;;  %v41_v13 = vld [vmem:[%s1839_s0 + $0xa] sm:$0x3]  ;;  %v61_v16 = vcombine.low %v38_v5, %v39_v6  ;;  %v233_v20 = vld [vmem:[%s1841_s2 + $0x18] sm:$0xff] }
   0x7   :  { %v63_v12 = vunpack.c.l.s4 %v1576_v11  ;;  %v42_v14 = vld [vmem:[%s1839_s0 + $0xc] sm:$0x3]  ;;  %v43_v15 = vld [vmem:[%s1839_s0 + $0xe] sm:$0x3]  ;;  %v77_v17 = vcombine.low %v40_v8, %v41_v13  ;;  %v1577_v23 = vmov 0.0|0.0   ;;  %v1687_v24 = vpack.c.bf16 %v231_v18, %v230_v9 }
   0x8   :  { %v78_v22 = vcombine.low %v42_v14, %v43_v15  ;;  %1405 = vmatprep.subr.bf16.mxu1 %v1577_v23  ;;  %1411 = vmatprep.subr.bf16.mxu0 %v1577_v23 }
   0x9   :  { %v64_v21 = vunpack.c.0.s8 %v63_v12 }
   0xa   :  { %19 = vsyncpa [#allocation8], 0  ;;  %vm1578_vm1 = vmmov 0   ;;  %v1579_v25 = vmov 0.0   ;;  %1407 = vmatpush3.bf16.msra.mxu1 %v1687_v24  ;;  %v1694_v27 = vpack.c.bf16 %v233_v20, %v232_v19  ;;  %vm94_vm2 = vcmask 31744   ;;  %s1581_s22 = smov 32  }
   0xb   :  { %1325 = vmatprep.mubr.msk.f32.mxu1 %vm1578_vm1, %v1579_v25  ;;  %v67_v26 = vsub.s32 %v64_v21, %v1660_v7  ;;  %1408 = vmatprep.subr.bf16.mxu1 %v1577_v23  ;;  %v234_v34 = vld [vmem:[%s1843_s4] sm:$0x3]  ;;  %vm237_vm3 = vcmask 261120   ;;  %vm344_vm4 = vcmask 254976   ;;  %s1584_s23 = smov [#allocation5]  }
   0xc   :  { %v1243_v35 = vld [vmem:[%s1842_s3] ss:$0 sm:$0xff]  ;;  %s1580_s3 = smov 64   ;;  %s1219_s1 = sshll.u32 %s1584_s23, 4  ;;  %s1220_s1 = int_to_ptr.vmem [resolvable:$true] %s1219_s1 }
   0xd   :  { %v68_v28 = vrot.slane %v60_v10, %v67_v26  ;;  %v75_v29 = vrot.slane %v61_v16, %v67_v26  ;;  %v85_v30 = vrot.slane %v77_v17, %v67_v26  ;;  %v92_v31 = vrot.slane %v78_v22, %v67_v26  ;;  %v235_v55 = vld [vmem:[%s1844_s5] sm:$0x3]  ;;  %s1528_s24 = scalar_lea.vmem %s1220_s1, 32  ;;  %p1533_p1 = scmp.lt.s32.totalorder %s1220_s1, %s1220_s1 }
   0xe   :  { %1410 = vmatpush3.bf16.msra.mxu1 %v1694_v27  ;;  %p1529_p0 = scmp.ne.s32.totalorder %s1220_s1, %s1528_s24  ;;  %p1534_p2 = scmp.lt.s32.totalorder %s1528_s24, %s1528_s24 }
   0xf   :  { %v76_v32 = vcombine.low %v68_v28, %v75_v29  ;;  %v93_v33 = vcombine.low %v85_v30, %v92_v31  ;;  %1417 = vmatprep.subr.bf16.mxu1 %v1577_v23 }
  0x10   :  { %p1535_p3 = por %p1534_p2, %p1533_p1 }
  0x11   :  { %1314 = vmatprep.mubr.msk.f32.mxu0 %vm94_vm2, %v76_v32  ;;  %1326 = vmatmul.mubr.msk.f32.vlgmr.msra.gmra.mrb[0].mxu1 %vm237_vm3, %v234_v34 }
  0x12   :  { %1315 = vmatmul.mubr.msk.f32.vlgmr.msra.gmra.mrb[0].mxu0 %vm94_vm2, %v93_v33  ;;  %1419 = vmatpush3.bf16.msra.mxu1 %v1687_v24  ;;  %p1536_p4 = pnand %p1535_p3, %p1529_p0 }
  0x13   :  { %1413 = vmatpush3.bf16.msra.mxu0 %v1687_v24  ;;  %1336 = vmatprep.mubr.msk.f32.mxu0 %vm1578_vm1, %v1579_v25 }
  0x14   :  { %1414 = vmatprep.subr.bf16.mxu0 %v1577_v23  ;;  %1420 = vmatprep.subr.bf16.mxu1 %v1577_v23 }
  0x15   :  { %1347 = vmatprep.mubr.msk.f32.mxu1 %vm1578_vm1, %v1579_v25 }
  0x16   :  { %1422 = vmatpush3.bf16.msra.mxu1 %v1694_v27 }
  0x17   :  { %1416 = vmatpush3.bf16.msra.mxu0 %v1694_v27  ;;  %1429 = vmatprep.subr.bf16.mxu1 %v1577_v23 }
  0x18   :  { %1423 = vmatprep.subr.bf16.mxu0 %v1577_v23 }
  0xe4   :  { %v307_v37 = vpop.f32.mrb[0].mxu1 }
  0xe5   :  { %v1316_v36 = vpop.f32.mrb[0].mxu0  ;;  %v1327_v40 = vpop.f32.mrb[1].mxu1 }
  0xe6   :  { %v175_v38 = vadd.f32 %v1316_v36, %v1243_v35  ;;  %v169_v39 = vpop.f32.mrb[1].mxu0 }
  0xe7   :  { %v170_v41 = vadd.f32 %v1243_v35, %v169_v39 }
  0xe8   :  { %v197_v42 = vcombine.high %v175_v38, %v175_v38  ;;  %v204_v43 = vrot.slane %v175_v38, %v67_v26  ;;  %1249 = vst.sshfl [vmem:[#allocation2 + $0x8] sm:$0x3 pattern:$0x76325410] %v175_v38 }
  0xe9   :  { %v180_v44 = vcombine.high %v170_v41, %v170_v41  ;;  %v187_v45 = vrot.slane %v170_v41, %v67_v26  ;;  %1247 = vst.sshfl [vmem:[#allocation2] sm:$0x3 pattern:$0x76325410] %v170_v41 }
  0xea   :  { %v211_v46 = vrot.slane %v197_v42, %v67_v26  ;;  %v212_v47 = vcombine.high %v204_v43, %v204_v43  ;;  %1250 = vst.sshfl [vmem:[#allocation2 + $0xc] sm:$0x3 pattern:$0x76325410] %v197_v42 }
  0xeb   :  { %v194_v48 = vrot.slane %v180_v44, %v67_v26  ;;  %v195_v49 = vcombine.high %v187_v45, %v187_v45  ;;  %1248 = vst.sshfl [vmem:[#allocation2 + $0x4] sm:$0x3 pattern:$0x76325410] %v180_v44 }
  0xec   :  { %v213_v50 = vcombine.high %v211_v46, %v211_v46  ;;  %227 = vst [vmem:[#allocation2 + $0xa] sm:$0x3] %v212_v47 }
  0xed   :  { %v196_v51 = vcombine.high %v194_v48, %v194_v48  ;;  %223 = vst [vmem:[#allocation2 + $0x2] sm:$0x3] %v195_v49 }
  0xee   :  { %229 = vst [vmem:[#allocation2 + $0xe] sm:$0x3] %v213_v50 }
  0xef   :  { %225 = vst [vmem:[#allocation2 + $0x6] sm:$0x3] %v196_v51 }
  0xf0   :  { %v236_v52 = vld [vmem:[#allocation2] sm:$0x3] }
  0xf1   :  { %v311_v53 = vadd.f32 %v307_v37, %v236_v52 }
  0xf2   :  { %v452_v30 = vld [vmem:[#allocation2 + $0x4] sm:$0x3] }
  0xf3   :  { %1464 = vtanh.f32 %v311_v53  ;;  %v1252_v56 = vmul.f32 -1.442695, %v311_v53 }
  0xf4   :  { %v347_v8 = vld [vmem:[#allocation2 + $0x2] sm:$0x3] }
  0xf5   :  { %1466 = vpow2.f32 %v1252_v56 }
  0xf6   :  { %v557_v48 = vld [vmem:[#allocation2 + $0x6] sm:$0x3] }
  0xfd   :  { %v1465_v54 = vpop.eup %1464 }
  0xfe   :  { %325 = vrot.lane.b32.xlu0 %v1465_v54, %s1580_s3 }
  0xff   :  { %v1467_v57 = vpop.eup %1466 }
 0x100   :  { %v315_v58 = vadd.f32 1.0, %v1467_v57 }
 0x102   :  { %320 = vrot.lane.b32.xlu0 %v235_v55, %s1581_s22  ;;  %1468 = vrcp.f32 %v315_v58 }
 0x10c   :  { %v1469_v59 = vpop.eup %1468 }
 0x170   :  { %v326_v60 = vpop.permute.xlu0 %325 }
 0x171   :  { %v328_v61 = vmul.f32 %v1469_v59, %v326_v60 }
 0x173   :  { %330 = vrot.lane.b32.xlu1 %v328_v61, %s1581_s22 }
 0x174   :  { %v321_v62 = vpop.permute.xlu0 %320 }
 0x175   :  { %v323_v63 = vmul.f32 %v1469_v59, %v321_v62 }
 0x1e5   :  { %v331_v0 = vpop.permute.xlu1 %330 }
 0x1e6   :  { %v333_v1 = vadd.f32 %v331_v0, %v323_v63 }
 0x1e8   :  { %1470 = vtanh.f32 %v333_v1 }
 0x1f2   :  { %v1471_v2 = vpop.eup %1470 }
 0x1f3   :  { %336 = vrot.lane.b32.xlu1 %v1471_v2, %s1580_s3  ;;  %v662_v2 = vld [vmem:[#allocation2 + $0x8] sm:$0x3] }
 0x265   :  { %v337_v4 = vpop.permute.xlu1 %336 }
 0x266   :  { %v339_v5 = vmul.f32 %v1469_v59, %v337_v4 }
 0x268   :  { %341 = vrot.lane.b32.xlu0 %v339_v5, %s1581_s22 }
 0x2da   :  { %v342_v6 = vpop.permute.xlu0 %341 }
 0x2db   :  { %345 = vst.msk [vmem:[#allocation3] sm:$0x3] %vm344_vm4, %v342_v6  ;;  %1337 = vmatmul.mubr.msk.f32.vlgmr.msra.gmra.mrb[2].mxu0 %vm237_vm3, %v342_v6 }
 0x2dc   :  { %1425 = vmatpush3.bf16.msra.mxu0 %v1687_v24  ;;  %1358 = vmatprep.mubr.msk.f32.mxu0 %vm1578_vm1, %v1579_v25 }
 0x2dd   :  { %1426 = vmatprep.subr.bf16.mxu0 %v1577_v23 }
 0x2e0   :  { %1428 = vmatpush3.bf16.msra.mxu0 %v1694_v27 }
 0x2e1   :  { %1435 = vmatprep.subr.bf16.mxu0 %v1577_v23 }
 0x3ae   :  { %v416_v9 = vpop.f32.mrb[2].mxu0 }
 0x3af   :  { %v420_v10 = vadd.f32 %v416_v9, %v347_v8  ;;  %v1338_v11 = vpop.f32.mrb[3].mxu0 }
 0x3b1   :  { %1472 = vtanh.f32 %v420_v10  ;;  %v1254_v13 = vmul.f32 -1.442695, %v420_v10 }
 0x3b3   :  { %1474 = vpow2.f32 %v1254_v13 }
 0x3bb   :  { %v1473_v12 = vpop.eup %1472 }
 0x3bc   :  { %430 = vrot.lane.b32.xlu1 %v1473_v12, %s1580_s3 }
 0x3bd   :  { %v1475_v14 = vpop.eup %1474 }
 0x3be   :  { %v424_v15 = vadd.f32 1.0, %v1475_v14 }
 0x3c0   :  { %1476 = vrcp.f32 %v424_v15 }
 0x3ca   :  { %v1477_v16 = vpop.eup %1476 }
 0x3cb   :  { %v428_v19 = vmul.f32 %v1477_v16, %v333_v1 }
 0x42e   :  { %v431_v17 = vpop.permute.xlu1 %430 }
 0x42f   :  { %v433_v18 = vmul.f32 %v1477_v16, %v431_v17 }
 0x431   :  { %435 = vrot.lane.b32.xlu0 %v433_v18, %s1581_s22 }
 0x4a3   :  { %v436_v20 = vpop.permute.xlu0 %435 }
 0x4a4   :  { %v438_v21 = vadd.f32 %v436_v20, %v428_v19 }
 0x4a6   :  { %1478 = vtanh.f32 %v438_v21 }
 0x4b0   :  { %v1479_v22 = vpop.eup %1478 }
 0x4b1   :  { %441 = vrot.lane.b32.xlu1 %v1479_v22, %s1580_s3  ;;  %v767_v22 = vld [vmem:[#allocation2 + $0xa] sm:$0x3] }
 0x523   :  { %v442_v26 = vpop.permute.xlu1 %441 }
 0x524   :  { %v444_v28 = vmul.f32 %v1477_v16, %v442_v26 }
 0x526   :  { %446 = vrot.lane.b32.xlu0 %v444_v28, %s1581_s22 }
 0x598   :  { %v447_v29 = vpop.permute.xlu0 %446 }
 0x599   :  { %450 = vst.msk [vmem:[#allocation3 + $0x2] sm:$0x3] %vm344_vm4, %v447_v29  ;;  %1348 = vmatmul.mubr.msk.f32.vlgmr.msra.gmra.mrb[2].mxu1 %vm237_vm3, %v447_v29 }
 0x59a   :  { %1431 = vmatpush3.bf16.msra.mxu1 %v1687_v24  ;;  %1369 = vmatprep.mubr.msk.f32.mxu1 %vm1578_vm1, %v1579_v25 }
 0x59b   :  { %1432 = vmatprep.subr.bf16.mxu1 %v1577_v23 }
 0x59e   :  { %1434 = vmatpush3.bf16.msra.mxu1 %v1694_v27 }
 0x59f   :  { %1441 = vmatprep.subr.bf16.mxu1 %v1577_v23 }
 0x66c   :  { %v521_v31 = vpop.f32.mrb[2].mxu1 }
 0x66d   :  { %v525_v32 = vadd.f32 %v521_v31, %v452_v30  ;;  %v1349_v33 = vpop.f32.mrb[3].mxu1 }
 0x66f   :  { %1480 = vtanh.f32 %v525_v32  ;;  %v1256_v35 = vmul.f32 -1.442695, %v525_v32 }
 0x671   :  { %1482 = vpow2.f32 %v1256_v35 }
 0x679   :  { %v1481_v34 = vpop.eup %1480 }
 0x67a   :  { %535 = vrot.lane.b32.xlu1 %v1481_v34, %s1580_s3 }
 0x67b   :  { %v1483_v36 = vpop.eup %1482 }
 0x67c   :  { %v529_v37 = vadd.f32 1.0, %v1483_v36 }
 0x67e   :  { %1484 = vrcp.f32 %v529_v37 }
 0x688   :  { %v1485_v38 = vpop.eup %1484 }
 0x689   :  { %v533_v41 = vmul.f32 %v1485_v38, %v438_v21 }
 0x6ec   :  { %v536_v39 = vpop.permute.xlu1 %535 }
 0x6ed   :  { %v538_v40 = vmul.f32 %v1485_v38, %v536_v39 }
 0x6ef   :  { %540 = vrot.lane.b32.xlu0 %v538_v40, %s1581_s22  ;;  %v872_v40 = vld [vmem:[#allocation2 + $0xc] sm:$0x3] }
 0x761   :  { %v541_v42 = vpop.permute.xlu0 %540 }
 0x762   :  { %v543_v43 = vadd.f32 %v541_v42, %v533_v41 }
 0x764   :  { %1486 = vtanh.f32 %v543_v43 }
 0x76e   :  { %v1487_v44 = vpop.eup %1486 }
 0x76f   :  { %546 = vrot.lane.b32.xlu1 %v1487_v44, %s1580_s3 }
 0x7e1   :  { %v547_v45 = vpop.permute.xlu1 %546 }
 0x7e2   :  { %v549_v46 = vmul.f32 %v1485_v38, %v547_v45 }
 0x7e4   :  { %551 = vrot.lane.b32.xlu0 %v549_v46, %s1581_s22 }
 0x856   :  { %v552_v47 = vpop.permute.xlu0 %551 }
 0x857   :  { %555 = vst.msk [vmem:[#allocation3 + $0x4] sm:$0x3] %vm344_vm4, %v552_v47  ;;  %1359 = vmatmul.mubr.msk.f32.vlgmr.msra.gmra.mrb[4].mxu0 %vm237_vm3, %v552_v47 }
 0x858   :  { %1437 = vmatpush3.bf16.msra.mxu0 %v1687_v24  ;;  %1380 = vmatprep.mubr.msk.f32.mxu0 %vm1578_vm1, %v1579_v25 }
 0x859   :  { %1438 = vmatprep.subr.bf16.mxu0 %v1577_v23 }
 0x85c   :  { %1440 = vmatpush3.bf16.msra.mxu0 %v1694_v27 }
 0x85d   :  { %1447 = vmatprep.subr.bf16.mxu0 %v1577_v23 }
 0x92a   :  { %v626_v49 = vpop.f32.mrb[4].mxu0 }
 0x92b   :  { %v630_v50 = vadd.f32 %v626_v49, %v557_v48  ;;  %v1360_v51 = vpop.f32.mrb[5].mxu0 }
 0x92d   :  { %1488 = vtanh.f32 %v630_v50  ;;  %v1258_v53 = vmul.f32 -1.442695, %v630_v50 }
 0x92f   :  { %1490 = vpow2.f32 %v1258_v53 }
 0x937   :  { %v1489_v52 = vpop.eup %1488 }
 0x938   :  { %640 = vrot.lane.b32.xlu1 %v1489_v52, %s1580_s3 }
 0x939   :  { %v1491_v54 = vpop.eup %1490 }
 0x93a   :  { %v634_v55 = vadd.f32 1.0, %v1491_v54 }
 0x93c   :  { %1492 = vrcp.f32 %v634_v55 }
 0x946   :  { %v1493_v56 = vpop.eup %1492 }
 0x947   :  { %v638_v59 = vmul.f32 %v1493_v56, %v543_v43 }
 0x9aa   :  { %v641_v57 = vpop.permute.xlu1 %640 }
 0x9ab   :  { %v643_v58 = vmul.f32 %v1493_v56, %v641_v57 }
 0x9ad   :  { %645 = vrot.lane.b32.xlu0 %v643_v58, %s1581_s22  ;;  %v977_v58 = vld [vmem:[#allocation2 + $0xe] sm:$0x3] }
 0xa1f   :  { %v646_v60 = vpop.permute.xlu0 %645 }
 0xa20   :  { %v648_v61 = vadd.f32 %v646_v60, %v638_v59 }
 0xa22   :  { %1494 = vtanh.f32 %v648_v61 }
 0xa2c   :  { %v1495_v62 = vpop.eup %1494 }
 0xa2d   :  { %651 = vrot.lane.b32.xlu1 %v1495_v62, %s1580_s3 }
 0xa9f   :  { %v652_v63 = vpop.permute.xlu1 %651 }
 0xaa0   :  { %v654_v0 = vmul.f32 %v1493_v56, %v652_v63 }
 0xaa2   :  { %656 = vrot.lane.b32.xlu0 %v654_v0, %s1581_s22 }
 0xb14   :  { %v657_v1 = vpop.permute.xlu0 %656 }
 0xb15   :  { %660 = vst.msk [vmem:[#allocation3 + $0x6] sm:$0x3] %vm344_vm4, %v657_v1  ;;  %1370 = vmatmul.mubr.msk.f32.vlgmr.msra.gmra.mrb[4].mxu1 %vm237_vm3, %v657_v1 }
 0xb16   :  { %1443 = vmatpush3.bf16.msra.mxu1 %v1687_v24  ;;  %1391 = vmatprep.mubr.msk.f32.mxu1 %vm1578_vm1, %v1579_v25 }
 0xb17   :  { %1444 = vmatprep.subr.bf16.mxu1 %v1577_v23 }
 0xb1a   :  { %1446 = vmatpush3.bf16.msra.mxu1 %v1694_v27 }
 0xbe8   :  { %v731_v4 = vpop.f32.mrb[4].mxu1 }
 0xbe9   :  { %v735_v5 = vadd.f32 %v731_v4, %v662_v2  ;;  %v1371_v6 = vpop.f32.mrb[5].mxu1 }
 0xbeb   :  { %1496 = vtanh.f32 %v735_v5  ;;  %v1260_v9 = vmul.f32 -1.442695, %v735_v5 }
 0xbed   :  { %1498 = vpow2.f32 %v1260_v9 }
 0xbf5   :  { %v1497_v8 = vpop.eup %1496 }
 0xbf6   :  { %745 = vrot.lane.b32.xlu1 %v1497_v8, %s1580_s3 }
 0xbf7   :  { %v1499_v10 = vpop.eup %1498 }
 0xbf8   :  { %v739_v11 = vadd.f32 1.0, %v1499_v10 }
 0xbfa   :  { %1500 = vrcp.f32 %v739_v11  ;;  %v1267_v11 = vld [vmem:[%s1845_s6] ss:$0 sm:$0xff]  ;;  %s1583_s6 = smov 96  }
 0xc04   :  { %v1501_v12 = vpop.eup %1500 }
 0xc05   :  { %v743_v15 = vmul.f32 %v1501_v12, %v648_v61 }
 0xc68   :  { %v746_v13 = vpop.permute.xlu1 %745 }
 0xc69   :  { %v748_v14 = vmul.f32 %v1501_v12, %v746_v13 }
 0xc6b   :  { %750 = vrot.lane.b32.xlu0 %v748_v14, %s1581_s22  ;;  %v1091_v14 = vld [vmem:[#allocation3 + $0x6] sm:$0x3] }
 0xcdd   :  { %v751_v16 = vpop.permute.xlu0 %750 }
 0xcde   :  { %v753_v17 = vadd.f32 %v751_v16, %v743_v15  ;;  %v1105_v16 = vmul.f32 %v1267_v11, %v1091_v14 }
 0xce0   :  { %1502 = vtanh.f32 %v753_v17 }
 0xcea   :  { %v1503_v18 = vpop.eup %1502 }
 0xceb   :  { %756 = vrot.lane.b32.xlu1 %v1503_v18, %s1580_s3  ;;  %v1119_v18 = vsel %vm344_vm4, %v1105_v16, 0.0 }
 0xd5d   :  { %v757_v19 = vpop.permute.xlu1 %756 }
 0xd5e   :  { %v759_v20 = vmul.f32 %v1501_v12, %v757_v19  ;;  %v1088_v12 = vld [vmem:[#allocation3] sm:$0x3] }
 0xd5f   :  { %v1102_v13 = vmul.f32 %v1267_v11, %v1088_v12 }
 0xd60   :  { %761 = vrot.lane.b32.xlu0 %v759_v20, %s1581_s22 }
 0xd61   :  { %v1110_v15 = vsel %vm344_vm4, %v1102_v13, 0.0 }
 0xdd2   :  { %v762_v21 = vpop.permute.xlu0 %761 }
 0xdd3   :  { %765 = vst.msk [vmem:[#allocation3 + $0x8] sm:$0x3] %vm344_vm4, %v762_v21  ;;  %1381 = vmatmul.mubr.msk.f32.vlgmr.msra.gmra.mrb[6].mxu0 %vm237_vm3, %v762_v21  ;;  %v1582_v21 = vmov 0  }
 0xdd4   :  { %1449 = vmatpush3.bf16.msra.mxu0 %v1687_v24  ;;  %1402 = vmatprep.mubr.msk.f32.mxu0 %vm1578_vm1, %v1579_v25 }
 0xdd5   :  { %1450 = vmatprep.subr.bf16.mxu0 %v1577_v23  ;;  %1463 = vset.pattern.permute.xlu0 %v1582_v21 }
 0xdd8   :  { %1452 = vmatpush3.bf16.msra.mxu0 %v1694_v27 }
 0xea6   :  { %v836_v26 = vpop.f32.mrb[6].mxu0 }
 0xea7   :  { %v840_v28 = vadd.f32 %v836_v26, %v767_v22  ;;  %v1382_v29 = vpop.f32.mrb[7].mxu0 }
 0xea9   :  { %1504 = vtanh.f32 %v840_v28  ;;  %v1262_v31 = vmul.f32 -1.442695, %v840_v28  ;;  %v1089_v28 = vld [vmem:[#allocation3 + $0x2] sm:$0x3] }
 0xeaa   :  { %v1103_v29 = vmul.f32 %v1267_v11, %v1089_v28 }
 0xeab   :  { %1506 = vpow2.f32 %v1262_v31 }
 0xeac   :  { %v1113_v31 = vsel %vm344_vm4, %v1103_v29, 0.0 }
 0xeb3   :  { %v1505_v30 = vpop.eup %1504 }
 0xeb4   :  { %850 = vrot.lane.b32.xlu1 %v1505_v30, %s1580_s3  ;;  %v1090_v30 = vld [vmem:[#allocation3 + $0x4] sm:$0x3] }
 0xeb5   :  { %v1507_v32 = vpop.eup %1506 }
 0xeb6   :  { %v844_v33 = vadd.f32 1.0, %v1507_v32  ;;  %v1104_v32 = vmul.f32 %v1267_v11, %v1090_v30 }
 0xeb8   :  { %1508 = vrcp.f32 %v844_v33  ;;  %v1092_v33 = vld [vmem:[#allocation3 + $0x8] sm:$0x3] }
 0xec2   :  { %v1509_v24 = vpop.eup %1508 }
 0xec3   :  { %v848_v23 = vmul.f32 %v1509_v24, %v753_v17 }
 0xf26   :  { %v851_v34 = vpop.permute.xlu1 %850 }
 0xf27   :  { %v853_v25 = vmul.f32 %v1509_v24, %v851_v34  ;;  %v1106_v34 = vmul.f32 %v1267_v11, %v1092_v33 }
 0xf29   :  { %855 = vrot.lane.b32.xlu0 %v853_v25, %s1581_s22 }
 0xf9b   :  { %v856_v27 = vpop.permute.xlu0 %855 }
 0xf9c   :  { %v858_v35 = vadd.f32 %v856_v27, %v848_v23  ;;  %v1122_v23 = vsel %vm344_vm4, %v1106_v34, 0.0 }
 0xf9e   :  { %1510 = vtanh.f32 %v858_v35 }
 0xfa8   :  { %v1511_v36 = vpop.eup %1510 }
 0xfa9   :  { %861 = vrot.lane.b32.xlu1 %v1511_v36, %s1580_s3  ;;  %v1268_v36 = vld [vmem:[#allocation4] ss:$0 sm:$0xff] }
0x101b   :  { %v862_v37 = vpop.permute.xlu1 %861 }
0x101c   :  { %v864_v38 = vmul.f32 %v1509_v24, %v862_v37  ;;  %v1116_v24 = vsel %vm344_vm4, %v1104_v32, 0.0 }
0x101e   :  { %866 = vrot.lane.b32.xlu0 %v864_v38, %s1581_s22 }
0x1090   :  { %v867_v39 = vpop.permute.xlu0 %866 }
0x1091   :  { %870 = vst.msk [vmem:[#allocation3 + $0xa] sm:$0x3] %vm344_vm4, %v867_v39  ;;  %1392 = vmatmul.mubr.msk.f32.vlgmr.msra.gmra.mrb[6].mxu1 %vm237_vm3, %v867_v39 }
0x1098   :  { %v1093_v17 = vld [vmem:[#allocation3 + $0xa] sm:$0x3] }
0x1099   :  { %v1107_v19 = vmul.f32 %v1267_v11, %v1093_v17 }
0x109b   :  { %v1125_v20 = vsel %vm344_vm4, %v1107_v19, 0.0 }
0x1164   :  { %v941_v41 = vpop.f32.mrb[6].mxu1 }
0x1165   :  { %v945_v42 = vadd.f32 %v941_v41, %v872_v40  ;;  %v1393_v43 = vpop.f32.mrb[7].mxu1 }
0x1167   :  { %1512 = vtanh.f32 %v945_v42  ;;  %v1264_v45 = vmul.f32 -1.442695, %v945_v42 }
0x1169   :  { %1514 = vpow2.f32 %v1264_v45 }
0x1171   :  { %v1513_v44 = vpop.eup %1512 }
0x1172   :  { %955 = vrot.lane.b32.xlu1 %v1513_v44, %s1580_s3 }
0x1173   :  { %v1515_v46 = vpop.eup %1514 }
0x1174   :  { %v949_v47 = vadd.f32 1.0, %v1515_v46 }
0x1176   :  { %1516 = vrcp.f32 %v949_v47 }
0x1180   :  { %v1517_v48 = vpop.eup %1516 }
0x1181   :  { %v953_v51 = vmul.f32 %v1517_v48, %v858_v35 }
0x11e4   :  { %v956_v49 = vpop.permute.xlu1 %955 }
0x11e5   :  { %v958_v50 = vmul.f32 %v1517_v48, %v956_v49 }
0x11e7   :  { %960 = vrot.lane.b32.xlu0 %v958_v50, %s1581_s22 }
0x1259   :  { %v961_v52 = vpop.permute.xlu0 %960 }
0x125a   :  { %v963_v53 = vadd.f32 %v961_v52, %v953_v51 }
0x125c   :  { %1518 = vtanh.f32 %v963_v53 }
0x1266   :  { %v1519_v54 = vpop.eup %1518 }
0x1267   :  { %966 = vrot.lane.b32.xlu1 %v1519_v54, %s1580_s3 }
0x12d9   :  { %v967_v55 = vpop.permute.xlu1 %966 }
0x12da   :  { %v969_v56 = vmul.f32 %v1517_v48, %v967_v55 }
0x12dc   :  { %971 = vrot.lane.b32.xlu0 %v969_v56, %s1581_s22 }
0x134e   :  { %v972_v57 = vpop.permute.xlu0 %971 }
0x134f   :  { %975 = vst.msk [vmem:[#allocation3 + $0xc] sm:$0x3] %vm344_vm4, %v972_v57  ;;  %1403 = vmatmul.mubr.msk.f32.vlgmr.msra.gmra.mrb[8].mxu0 %vm237_vm3, %v972_v57 }
0x1356   :  { %v1094_v25 = vld [vmem:[#allocation3 + $0xc] sm:$0x3] }
0x1357   :  { %v1108_v27 = vmul.f32 %v1267_v11, %v1094_v25 }
0x1359   :  { %v1128_v35 = vsel %vm344_vm4, %v1108_v27, 0.0 }
0x1422   :  { %v1046_v59 = vpop.f32.mrb[8].mxu0 }
0x1423   :  { %v1050_v60 = vadd.f32 %v1046_v59, %v977_v58  ;;  %v1404_v61 = vpop.f32.mrb[9].mxu0 }
0x1425   :  { %1520 = vtanh.f32 %v1050_v60  ;;  %v1266_v63 = vmul.f32 -1.442695, %v1050_v60 }
0x1427   :  { %1522 = vpow2.f32 %v1266_v63 }
0x142f   :  { %v1521_v62 = vpop.eup %1520 }
0x1430   :  { %1060 = vrot.lane.b32.xlu1 %v1521_v62, %s1580_s3 }
0x1431   :  { %v1523_v0 = vpop.eup %1522 }
0x1432   :  { %v1054_v1 = vadd.f32 1.0, %v1523_v0 }
0x1434   :  { %1524 = vrcp.f32 %v1054_v1 }
0x143e   :  { %v1525_v2 = vpop.eup %1524 }
0x143f   :  { %v1058_v6 = vmul.f32 %v1525_v2, %v963_v53 }
0x14a2   :  { %v1061_v4 = vpop.permute.xlu1 %1060 }
0x14a3   :  { %v1063_v5 = vmul.f32 %v1525_v2, %v1061_v4 }
0x14a5   :  { %1065 = vrot.lane.b32.xlu0 %v1063_v5, %s1581_s22 }
0x1517   :  { %v1066_v8 = vpop.permute.xlu0 %1065 }
0x1518   :  { %v1068_v9 = vadd.f32 %v1066_v8, %v1058_v6 }
0x151a   :  { %1526 = vtanh.f32 %v1068_v9 }
0x1524   :  { %v1527_v10 = vpop.eup %1526 }
0x1525   :  { %1071 = vrot.lane.b32.xlu1 %v1527_v10, %s1580_s3 }
0x1549   :  { %1111 = vadd.xlane.f32.xlu1 %v1110_v15 }
0x154d   :  { %1120 = vadd.xlane.f32.xlu1 %v1119_v18 }
0x1551   :  { %1126 = vadd.xlane.f32.xlu1 %v1125_v20 }
0x1597   :  { %v1072_v22 = vpop.permute.xlu1 %1071 }
0x1598   :  { %v1074_v26 = vmul.f32 %v1525_v2, %v1072_v22 }
0x159a   :  { %1076 = vrot.lane.b32.xlu0 %v1074_v26, %s1581_s22 }
0x15b9   :  { %1114 = vadd.xlane.f32.xlu0 %v1113_v31 }
0x15bd   :  { %1117 = vadd.xlane.f32.xlu0 %v1116_v24 }
0x15c1   :  { %1123 = vadd.xlane.f32.xlu0 %v1122_v23 }
0x15c5   :  { %1129 = vadd.xlane.f32.xlu0 %v1128_v35 }
0x15db   :  { %1141 = vperm.xlu0 %1463, %v1268_v36  }
0x160c   :  { %v1077_v37 = vpop.permute.xlu0 %1076 }
0x160d   :  { %1080 = vst.msk [vmem:[#allocation3 + $0xe] sm:$0x3] %vm344_vm4, %v1077_v37  ;;  %1081 = vst.msk [vmem:[#allocation5] sm:$0x3] %vm344_vm4, %v1077_v37 }
0x1614   :  { %v1095_v38 = vld [vmem:[#allocation3 + $0xe] sm:$0x3] }
0x1615   :  { %v1109_v39 = vmul.f32 %v1267_v11, %v1095_v38 }
0x1617   :  { %v1131_v40 = vsel %vm344_vm4, %v1109_v39, 0.0 }
0x1618   :  { %1132 = vadd.xlane.f32.xlu1 %v1131_v40 }
0x1629   :  { %1083 = vrot.lane.b32.xlu1 %v1068_v9, %s1583_s6 }
0x162a   :  { %1539 = shalt.err (!%p1536_p4)
}
0x162b   :  { %s1540_s27 = scalar_lea.hbm %s1848_s9, 32 }
0x162c   :  { %p1541_p5 = scmp.ne.s32.totalorder %s1848_s9, %s1540_s27  ;;  %p1544_p6 = scmp.lt.u32.totalorder %s1540_s27, %s1848_s9 }
0x162e   :  { %p1546_p7 = pnand %p1544_p6, %p1541_p5 }
0x1630   :  { %1549 = shalt.err (!%p1546_p7)
}
0x1631   :  { %1222 = dma.vmem_to_hbm [thread:$0]  %s1220_s1, 32, %s1848_s9, [#allocation6]   ;;  %v1161_v45 = vand.u32 127, %v65_v3  ;;  %v1112_v47 = vpop.xlane.xlu1 %1111  ;;  %vm1194_vm5 = vcmask 1041409   ;;  %vm1196_vm6 = vcmask 1042434   ;;  %vm1198_vm7 = vcmask 1043459  }
0x1632   :  { %vm1200_vm8 = vcmask 1044484   ;;  %vm1202_vm9 = vcmask 1045509   ;;  %s1585_s9 = smov [#allocation7]   ;;  %vm1204_vm10 = vcmask 1046534   ;;  %vm1206_vm11 = vcmask 1047559  }
0x1633   :  { %v1164_v48 = vsub.s32 %v1161_v45, %v1660_v7  ;;  %s1229_s14 = sshll.u32 %s1585_s9, 4  ;;  %vm1209_vm12 = vcmask 15360   ;;  %s1230_s14 = int_to_ptr.vmem [resolvable:$true] %s1229_s14 }
0x1634   :  { %s1550_s17 = scalar_lea.vmem %s1230_s14, 32  ;;  %p1555_p9 = scmp.lt.s32.totalorder %s1230_s14, %s1230_s14 }
0x1635   :  { %v1121_v54 = vpop.xlane.xlu1 %1120  ;;  %p1551_p8 = scmp.ne.s32.totalorder %s1230_s14, %s1550_s17  ;;  %p1556_p10 = scmp.lt.s32.totalorder %s1550_s17, %s1550_s17 }
0x1637   :  { %p1557_p11 = por %p1556_p10, %p1555_p9 }
0x1639   :  { %v1127_v3 = vpop.xlane.xlu1 %1126  ;;  %p1558_p12 = pnand %p1557_p11, %p1551_p8 }
0x1646   :  { %v1115_v41 = vpop.xlane.xlu0 %1114 }
0x164a   :  { %v1118_v42 = vpop.xlane.xlu0 %1117 }
0x164e   :  { %v1124_v43 = vpop.xlane.xlu0 %1123 }
0x1652   :  { %v1130_v44 = vpop.xlane.xlu0 %1129 }
0x165a   :  { %v1142_v46 = vpop.permute.xlu0 %1141 }
0x165b   :  { %v1144_v49 = vadd.f32 %v1142_v46, %v1112_v47  ;;  %v1145_v50 = vadd.f32 %v1142_v46, %v1115_v41  ;;  %v1146_v51 = vadd.f32 %v1142_v46, %v1118_v42  ;;  %v1147_v56 = vadd.f32 %v1142_v46, %v1121_v54 }
0x165c   :  { %v1148_v58 = vadd.f32 %v1142_v46, %v1124_v43  ;;  %v1149_v61 = vadd.f32 %v1142_v46, %v1127_v3  ;;  %v1150_v63 = vadd.f32 %v1142_v46, %v1130_v44 }
0x165d   :  { %v1165_v52 = vrot.slane %v1144_v49, %v1164_v48  ;;  %v1169_v53 = vrot.slane %v1145_v50, %v1164_v48  ;;  %v1173_v55 = vrot.slane %v1146_v51, %v1164_v48  ;;  %v1177_v60 = vrot.slane %v1147_v56, %v1164_v48 }
0x165e   :  { %v1181_v7 = vrot.slane %v1148_v58, %v1164_v48  ;;  %v1185_v1 = vrot.slane %v1149_v61, %v1164_v48  ;;  %v1189_v6 = vrot.slane %v1150_v63, %v1164_v48 }
0x165f   :  { %v1195_v57 = vsel %vm1194_vm5, %v1169_v53, %v1165_v52 }
0x1660   :  { %v1197_v59 = vsel %vm1196_vm6, %v1173_v55, %v1195_v57 }
0x1661   :  { %v1199_v62 = vsel %vm1198_vm7, %v1177_v60, %v1197_v59 }
0x1662   :  { %v1201_v0 = vsel %vm1200_vm8, %v1181_v7, %v1199_v62 }
0x1663   :  { %v1203_v4 = vsel %vm1202_vm9, %v1185_v1, %v1201_v0 }
0x1664   :  { %v1205_v9 = vsel %vm1204_vm10, %v1189_v6, %v1203_v4 }
0x16a5   :  { %v1133_v2 = vpop.xlane.xlu1 %1132 }
0x16a6   :  { %v1151_v5 = vadd.f32 %v1142_v46, %v1133_v2 }
0x16a8   :  { %v1193_v8 = vrot.slane %v1151_v5, %v1164_v48 }
0x16a9   :  { %v1084_v10 = vpop.permute.xlu1 %1083 }
0x16aa   :  { %v1207_v11 = vsel %vm1206_vm11, %v1193_v8, %v1205_v9  ;;  %1086 = vst.msk [vmem:[#allocation7] sm:$0x3] %vm344_vm4, %v1084_v10 }
0x16ab   :  { %1210 = vst.msk [vmem:[%s1847_s8] sm:$0xff] %vm1209_vm12, %v1207_v11 }
0x16ac   :  { %1561 = shalt.err (!%p1558_p12)
}
0x16ad   :  { %s1562_s2 = scalar_lea.hbm %s1849_s10, 32 }
0x16ae   :  { %p1563_p13 = scmp.ne.s32.totalorder %s1849_s10, %s1562_s2  ;;  %p1566_p0 = scmp.lt.u32.totalorder %s1562_s2, %s1849_s10 }
0x16b0   :  { %p1568_p1 = pnand %p1566_p0, %p1563_p13 }
0x16b2   :  { %1571 = shalt.err (!%p1568_p1)
}
0x16b3   :  { %1232 = dma.vmem_to_hbm [thread:$0]  %s1230_s14, 32, %s1849_s10, [#allocation8]  }
0x16b4   :  { %1572 = dma.done.wait [#allocation6], 32  }
0x16b5   :  { %1573 = vsyncadd [#allocation6], 4294967264 }
0x16b6   :  { %1574 = dma.done.wait [#allocation8], 32  }
0x16b7   :  { %1575 = vsyncadd [#allocation8], 4294967264 }
0x16b8   :  { %1241 = vsyncpa [#allocation6], 1 }
0x16b9   :  { %1242 = vsyncpa [#allocation8], 1 }

</bundles_post_ra>
